<compile_context>
chip_gen: v6e
topology: v6e:2x2x1
jax: 0.10.0
libtpu: 0.0.40
codegen_flags: <defaults>
</compile_context>

<pallas_src>
import jax
import jax.numpy as jnp
from jax.experimental import pallas as pl
from jax.experimental.pallas import tpu as pltpu


def _make_concat_kernel(chw: int, phw: int):
    """Kernel writing cond lanes then broadcast params lanes (2D lane-dense layout)."""

    def kernel(cond_ref, params_ref, out_ref):
        # cond_ref:   (bt, C*HW)        conditioning input block
        # params_ref: (1,  P*HW)        shared learnable location params (VMEM resident)
        # out_ref:    (bt, (C+P)*HW)    concatenated output block
        out_ref[:, :chw] = cond_ref[...].astype(out_ref.dtype)
        # (1, P*HW) row -> sublane broadcast to bt rows; cheap, no large temporary.
        p = params_ref[...].astype(out_ref.dtype)
        out_ref[:, chw:] = jnp.broadcast_to(p, (out_ref.shape[0], phw))

    return kernel


def _pick_bt(batch: int, bt_budget: int) -> int:
    """Batch tile: either == batch, or a multiple of 8 (preferably dividing batch)."""
    if bt_budget >= batch:
        return batch
    bt = min(batch, max(8, (bt_budget // 8) * 8))
    if bt == batch:
        return bt
    # Prefer a multiple of 8 that divides batch (avoids a padded final block).
    for cand in range(bt, 7, -8):
        if batch % cand == 0:
            return cand
    return bt  # padded last block; Pallas masks the writeback, still correct.


def location_params_forward(
    cond: jax.Array,
    params: jax.Array,
    *,
    vmem_budget_bytes: int = 8 * 1024 * 1024,
) -> jax.Array:
    """cond: (B, C, H, W), params: (P, H, W) -> (B, C+P, H, W)."""
    B, C, H, W = cond.shape
    P, Hp, Wp = params.shape
    assert (Hp, Wp) == (H, W), "params spatial size must match cond spatial size"

    HW = H * W
    CHW = C * HW
    PHW = P * HW

    # torch.cat type-promotes (e.g. bf16 cond + f32 params -> f32 output).
    out_dtype = jnp.promote_types(cond.dtype, params.dtype)

    # Lane-dense 2D views (free metadata reshapes of contiguous NCHW rows).
    cond2 = cond.reshape(B, CHW)
    params2 = params.reshape(1, PHW)

    cond_isz = jnp.dtype(cond2.dtype).itemsize
    par_isz = jnp.dtype(params2.dtype).itemsize
    out_isz = jnp.dtype(out_dtype).itemsize

    # Per-batch-element bytes moving through VMEM (cond block read + out block write).
    per_batch = CHW * cond_isz + (CHW + PHW) * out_isz

    # Batch tile from the VMEM budget (x2 for double-buffering).
    bt_budget = vmem_budget_bytes // max(1, 2 * per_batch)
    if B >= 16:
        # Ensure >= 2 grid steps so both v7x TensorCores stream concurrently.
        bt_budget = min(bt_budget, pl.cdiv(B, 2))
    bt = _pick_bt(B, bt_budget)
    grid = (pl.cdiv(B, bt),)

    # Scoped-VMEM limit derived from the actual blocks (+ broadcast temp + headroom),
    # capped well under v7x's 64 MiB physical VMEM.
    cond_block = bt * CHW * cond_isz
    out_block = bt * (CHW + PHW) * out_isz
    need = 2 * (cond_block + out_block) + 2 * PHW * par_isz + bt * PHW * out_isz
    vmem_limit = int(min(48 << 20, max(need + (2 << 20), 8 << 20)))

    kernel = _make_concat_kernel(CHW, PHW)

    out2 = pl.pallas_call(
        kernel,
        out_shape=jax.ShapeDtypeStruct((B, CHW + PHW), out_dtype),
        grid_spec=pltpu.PrefetchScalarGridSpec(
            num_scalar_prefetch=0,
            grid=grid,
            in_specs=[
                # bt batch rows per grid step, each a contiguous C*HW lane slab.
                pl.BlockSpec((bt, CHW), lambda b: (b, 0)),
                # Params: same block every step -> VMEM resident, no re-DMA.
                pl.BlockSpec((1, PHW), lambda b: (0, 0)),
            ],
            out_specs=pl.BlockSpec((bt, CHW + PHW), lambda b: (b, 0)),
        ),
        compiler_params=pltpu.CompilerParams(
            # Batch-block axis is independent work -> shard across TCs on v7x.
            dimension_semantics=("parallel",),
            vmem_limit_bytes=vmem_limit,
        ),
        cost_estimate=pl.CostEstimate(
            flops=0,
            transcendentals=0,
            bytes_accessed=B * CHW * cond_isz
            + PHW * par_isz
            + B * (CHW + PHW) * out_isz,
        ),
    )(cond2, params2)

    return out2.reshape(B, C + P, H, W)


def init_location_params(key, n_channels: int, size: int, dtype=jnp.float32):
    """Matches torch.nn.init.kaiming_normal_(mode='fan_out') for a (P, size, size) tensor.

    fan_out = shape[0] * receptive_field = n_channels * size; gain = sqrt(2);
    std = gain / sqrt(fan_out).
    """
    fan_out = n_channels * size
    std = (2.0 / fan_out) ** 0.5
    return std * jax.random.normal(key, (n_channels, size, size), dtype=dtype)


if __name__ == "__main__":
    key = jax.random.PRNGKey(0)
    k_cond, k_params = jax.random.split(key)

    B, C, H, W = 2, 4, 16, 16   # cond: batch=2, channels=4, spatial=16
    P = 3                       # number of learnable location-param channels

    cond = jax.random.normal(k_cond, (B, C, H, W), dtype=jnp.float32)
    params = init_location_params(k_params, P, H)

    out = jax.block_until_ready(location_params_forward(cond, params))

    # Reference check (plain JAX concat + broadcast).
    ref = jnp.concatenate(
        [cond, jnp.broadcast_to(params[None], (B, P, H, W))], axis=1
    )
    assert out.shape == (B, C + P, H, W)
    assert out.dtype == ref.dtype
    assert jnp.allclose(out, ref), "Pallas output mismatch vs reference (f32)"

    # Mixed-dtype check: bf16 cond + f32 params -> f32 output (torch.cat promotion).
    cond_bf16 = cond.astype(jnp.bfloat16)
    out_mixed = jax.block_until_ready(location_params_forward(cond_bf16, params))
    ref_mixed = jnp.concatenate(
        [cond_bf16.astype(jnp.float32), jnp.broadcast_to(params[None], (B, P, H, W))],
        axis=1,
    )
    assert out_mixed.dtype == jnp.float32
    assert jnp.allclose(out_mixed, ref_mixed), "Pallas output mismatch vs reference (mixed dtype)"

    # Padded-final-block check: B not divisible by bt (tiny budget forces bt=8, grid=2).
    B2 = 10
    cond_odd = jax.random.normal(k_cond, (B2, C, H, W), dtype=jnp.float32)
    out_odd = jax.block_until_ready(
        location_params_forward(cond_odd, params, vmem_budget_bytes=1)
    )
    ref_odd = jnp.concatenate(
        [cond_odd, jnp.broadcast_to(params[None], (B2, P, H, W))], axis=1
    )
    assert jnp.allclose(out_odd, ref_odd), "Pallas output mismatch vs reference (padded block)"

    print("KERNEL_OK")
</pallas_src>

<mosaic_0001>
module attributes {stable_mosaic.version = 11 : i64} {
  func.func @kernel(%arg0: i32, %arg1: memref<2x1024xf32, #tpu.memory_space<vmem>>, %arg2: memref<1x768xf32, #tpu.memory_space<vmem>>, %arg3: memref<2x1792xf32, #tpu.memory_space<vmem>>) attributes {dimension_semantics = [#tpu.dimension_semantics<parallel>], iteration_bounds = array<i64: 1>, scalar_prefetch = 0 : i64, scratch_operands = 0 : i64, tpu.core_type = #tpu.core_type<tc>, window_params = [{transform_indices = @transform_0, window_bounds = array<i64: 2, 1024>}, {pipeline_mode = #tpu.pipeline_mode<synchronous>, transform_indices = @transform_1, window_bounds = array<i64: 1, 768>}, {transform_indices = @transform_2, window_bounds = array<i64: 2, 1792>}]} {
    %c0 = arith.constant 0 : index
    %c0_0 = arith.constant 0 : index
    %0 = vector.load %arg1[%c0, %c0_0] : memref<2x1024xf32, #tpu.memory_space<vmem>>, vector<2x1024xf32>
    %c0_1 = arith.constant 0 : index
    %c0_2 = arith.constant 0 : index
    %1 = vector.load %arg3[%c0_1, %c0_2] : memref<2x1792xf32, #tpu.memory_space<vmem>>, vector<2x1024xf32>
    tpu.vector_store %arg3[%c0_1, %c0_2], %0 {strides = array<i32>} : memref<2x1792xf32, #tpu.memory_space<vmem>>, vector<2x1024xf32>,
    %c0_3 = arith.constant 0 : index
    %c0_4 = arith.constant 0 : index
    %2 = vector.load %arg2[%c0_3, %c0_4] : memref<1x768xf32, #tpu.memory_space<vmem>>, vector<1x768xf32>
    %3 = vector.shape_cast %2 : vector<1x768xf32> to vector<1x768xf32>
    %4 = vector.broadcast %3 : vector<1x768xf32> to vector<2x768xf32>
    %c0_5 = arith.constant 0 : index
    %c1024 = arith.constant 1024 : index
    %5 = vector.load %arg3[%c0_5, %c1024] : memref<2x1792xf32, #tpu.memory_space<vmem>>, vector<2x768xf32>
    tpu.vector_store %arg3[%c0_5, %c1024], %4 {strides = array<i32>} : memref<2x1792xf32, #tpu.memory_space<vmem>>, vector<2x768xf32>,
    return
  }
  func.func @transform_0(%arg0: i32) -> (i32, i32) {
    %c0_i32 = arith.constant 0 : i32
    %c0_i32_0 = arith.constant 0 : i32
    return %arg0, %c0_i32 : i32, i32
  }
  func.func @transform_1(%arg0: i32) -> (i32, i32) {
    %c0_i32 = arith.constant 0 : i32
    %c0_i32_0 = arith.constant 0 : i32
    %c0_i32_1 = arith.constant 0 : i32
    return %c0_i32, %c0_i32_0 : i32, i32
  }
  func.func @transform_2(%arg0: i32) -> (i32, i32) {
    %c0_i32 = arith.constant 0 : i32
    %c0_i32_0 = arith.constant 0 : i32
    return %arg0, %c0_i32 : i32, i32
  }
}

</mosaic_0001>

<bundles_post_ra>
// kernel: tpu_custom_call.1
= control target key start
LH: loop header
LB: loop body
LE: loop exit
PB: predicated region body
PF: predicated region fallthrough
CT: control target
= control target key end

     0   :  { %7 = vsyncpa [#allocation3], 0  ;;  %s210_s0 = inlined_call_operand.hbm [shape: f32[2,1024], index: 0, kind: input, shape index: {}]   ;;  %s211_s1 = inlined_call_operand.hbm [shape: f32[1,768], index: 1, kind: input, shape index: {}]   ;;  %s212_s2 = inlined_call_operand.hbm [shape: f32[2,1792], index: 2, kind: output, shape index: {}]  }
   0x1   :  { %8 = vsyncpa [#allocation6], 0 }
   0x2   :  { %9 = vsyncpa [#allocation4], 0  ;;  %s182_s9 = smov [#allocation2]   ;;  %s183_s11 = smov [#allocation5]  }
   0x3   :  { %s16_s10 = sshll.u32 %s182_s9, 4  ;;  %s26_s12 = sshll.u32 %s183_s11, 4  ;;  %s17_s10 = int_to_ptr.vmem [resolvable:$true] %s16_s10  ;;  %s27_s12 = int_to_ptr.vmem [resolvable:$true] %s26_s12 }
   0x4   :  { %s124_s13 = scalar_lea.vmem %s17_s10, 256  ;;  %p129_p1 = scmp.lt.s32.totalorder %s17_s10, %s17_s10 }
   0x5   :  { %p125_p0 = scmp.ne.s32.totalorder %s17_s10, %s124_s13  ;;  %p130_p2 = scmp.lt.s32.totalorder %s124_s13, %s124_s13 }
   0x7   :  { %p131_p3 = por %p130_p2, %p129_p1 }
   0x9   :  { %p132_p4 = pnand %p131_p3, %p125_p0 }
   0xb   :  { %135 = shalt.err (!%p132_p4)
}
   0xc   :  { %19 = dma.hbm_to_vmem [thread:$0]  %s210_s0, 256, %s17_s10, [#allocation3]  }
   0xd   :  { %s144_s16 = scalar_lea.vmem %s27_s12, 96  ;;  %p149_p6 = scmp.lt.s32.totalorder %s27_s12, %s27_s12 }
   0xe   :  { %p145_p5 = scmp.ne.s32.totalorder %s27_s12, %s144_s16  ;;  %p150_p7 = scmp.lt.s32.totalorder %s144_s16, %s144_s16 }
  0x10   :  { %p151_p8 = por %p150_p7, %p149_p6 }
  0x12   :  { %p152_p9 = pnand %p151_p8, %p145_p5 }
  0x14   :  { %155 = shalt.err (!%p152_p9)
}
  0x15   :  { %29 = dma.hbm_to_vmem [thread:$0]  %s211_s1, 96, %s27_s12, [#allocation6]  }
  0x16   :  { %176 = dma.done.wait [#allocation3], 256  }
  0x17   :  { %177 = vsyncadd [#allocation3], 4294967040 }
  0x18   :  { %178 = dma.done.wait [#allocation6], 96  }
  0x19   :  { %179 = vsyncadd [#allocation6], 4294967200  ;;  %v42_v0 = vlaneseq  ;;  %v184_v1 = vmov 1983009808   ;;  %v36_v11 = vld [vmem:[#allocation2] sm:$0xff]  ;;  %v37_v12 = vld [vmem:[#allocation2 + $0x8] sm:$0xff] }
  0x1a   :  { %v69_v2 = vunpack.c.l.s4 %v184_v1  ;;  %v40_v13 = vld [vmem:[#allocation5] sm:$0x3f]  ;;  %38 = vst [vmem:[#allocation7] sm:$0xff] %v36_v11  ;;  %39 = vst [vmem:[#allocation7 + $0x8] sm:$0xff] %v37_v12  ;;  %s185_s0 = smov [#allocation7]  }
  0x1b   :  { %v43_v3 = vshrl.u32 %v42_v0, 7  ;;  %s101_s1 = sshll.u32 %s185_s0, 4  ;;  %s102_s1 = int_to_ptr.vmem [resolvable:$true] %s101_s1 }
  0x1c   :  { %v70_v4 = vunpack.c.0.s8 %v69_v2  ;;  %s156_s19 = scalar_lea.vmem %s102_s1, 448  ;;  %p161_p11 = scmp.lt.s32.totalorder %s102_s1, %s102_s1 }
  0x1d   :  { %v44_v5 = vsub.s32 0, %v43_v3  ;;  %v48_v6 = vsub.s32 1, %v43_v3  ;;  %v52_v7 = vsub.s32 2, %v43_v3  ;;  %v56_v8 = vsub.s32 3, %v43_v3  ;;  %p157_p10 = scmp.ne.s32.totalorder %s102_s1, %s156_s19  ;;  %p162_p12 = scmp.lt.s32.totalorder %s156_s19, %s156_s19 }
  0x1e   :  { %v60_v9 = vsub.s32 4, %v43_v3  ;;  %v64_v10 = vsub.s32 5, %v43_v3  ;;  %v73_v14 = vsub.s32 %v70_v4, %v43_v3 }
  0x1f   :  { %v45_v15 = vrot.slane %v40_v13, %v44_v5  ;;  %v49_v16 = vrot.slane %v40_v13, %v48_v6  ;;  %v53_v17 = vrot.slane %v40_v13, %v52_v7  ;;  %v57_v18 = vrot.slane %v40_v13, %v56_v8  ;;  %p163_p13 = por %p162_p12, %p161_p11 }
  0x20   :  { %v61_v19 = vrot.slane %v40_v13, %v60_v9  ;;  %v65_v20 = vrot.slane %v40_v13, %v64_v10 }
  0x21   :  { %v66_v21 = vcombine.low %v45_v15, %v49_v16  ;;  %v67_v22 = vcombine.low %v53_v17, %v57_v18  ;;  %p164_p0 = pnand %p163_p13, %p157_p10 }
  0x22   :  { %v83_v23 = vcombine.low %v61_v19, %v65_v20 }
  0x23   :  { %v74_v24 = vrot.slane %v66_v21, %v73_v14  ;;  %v81_v25 = vrot.slane %v67_v22, %v73_v14 }
  0x24   :  { %111 = vst.sshfl [vmem:[#allocation7 + $0x18] sm:$0x33 pattern:$0x76325410] %v83_v23 }
  0x25   :  { %v82_v26 = vcombine.low %v74_v24, %v81_v25 }
  0x27   :  { %93 = vst [vmem:[#allocation7 + $0x10] sm:$0xff] %v82_v26 }
  0x28   :  { %167 = shalt.err (!%p164_p0)
}
  0x29   :  { %104 = dma.vmem_to_hbm [thread:$0]  %s102_s1, 448, %s212_s2, [#allocation4]  }
  0x2a   :  { %180 = dma.done.wait [#allocation4], 448  }
  0x2b   :  { %181 = vsyncadd [#allocation4], 4294966848 }
  0x2c   :  { %108 = vsyncpa [#allocation3], 1 }
  0x2d   :  { %109 = vsyncpa [#allocation6], 1 }
  0x2e   :  { %110 = vsyncpa [#allocation4], 1 }

</bundles_post_ra>
